<compile_context>
chip_gen: v7x
topology: tpu7x:2x2x1
jax: 0.10.0
libtpu: 0.0.40
codegen_flags: <defaults>
</compile_context>

<pallas_src>
import jax
import jax.numpy as jnp
from jax.experimental import pallas as pl
from jax.experimental.pallas import tpu as pltpu

BN_EPS = 1e-3


# ------------------------------ Pallas kernel -------------------------------

def _make_mixed3a_kernel(Ho, Wo, Cin, Cout):
    """Fused maxpool(3,s2) + conv3x3(s2) + folded-BN + ReLU for one image.

    Input xr layout (parity-folded space-to-depth, channels-last):
        xr[n, qh, qw, (2*ph + pw)*Cin + c] == x_nhwc[n, 2*qh + ph, 2*qw + pw, c]
    A window slice at offset (rh, rw) therefore holds 4 conv taps
    (dh = 2*rh + ph, dw = 2*rw + pw) stacked along a full 256-wide lane dim.
    """
    P = Ho * Wo
    NG = 4 * Cin                                # 256 lanes per pixel

    # Window s = 2*rh + rw; lane group g = 2*ph + pw; tap = (2*rh+ph, 2*rw+pw).
    # Valid (< 3x3) lane groups per window, used by the maxpool branch.
    POOL_GROUPS = {0: (0, 1, 2, 3), 1: (0, 2), 2: (0, 1), 3: (0,)}
    WINDOWS = ((0, 0), (0, 1), (1, 0), (1, 1))

    def kernel(xr_ref, w_ref, scale_ref, bias_ref, out_ref):
        # xr_ref:    (1, Ho+1, Wo+1, 4*Cin)   parity-folded image
        # w_ref:     (4, Cout, 4*Cin) bf16    per-window tap-merged weights
        # scale/bias:(Cout, 1) f32            folded BatchNorm (inference stats)
        # out_ref:   (1, Cin+Cout, P)         channel-major fused output
        acc = jnp.zeros((Cout, P), jnp.float32)
        pool = jnp.full((P, Cin), -jnp.inf, jnp.float32)

        for s, (rh, rw) in enumerate(WINDOWS):          # static, fully unrolled
            win = xr_ref[0, rh:rh + Ho, rw:rw + Wo, :].reshape(P, NG)  # f32
            # Conv: (Cout, 256) · (P, 256)^T -> (Cout, P); bf16 MXU, f32 acc.
            acc = acc + jax.lax.dot_general(
                w_ref[s], win.astype(jnp.bfloat16),
                (((1,), (1,)), ((), ())),
                preferred_element_type=jnp.float32)
            # Maxpool: exact f32 max over the valid 64-channel lane groups.
            for g in POOL_GROUPS[s]:
                pool = jnp.maximum(pool, win[:, g * Cin:(g + 1) * Cin])

        conv = jnp.maximum(acc * scale_ref[...] + bias_ref[...], 0.0)
        # PyTorch channel order: [maxpool (Cin), conv (Cout)], channel-major.
        out_ref[0, :Cin, :] = jnp.transpose(pool).astype(out_ref.dtype)
        out_ref[0, Cin:, :] = conv.astype(out_ref.dtype)

    return kernel


# ------------------------------ op wrapper ----------------------------------

def mixed_3a_forward(x_nchw, params):
    N, Cin, H, W = x_nchw.shape
    Cout = params["w"].shape[0]
    Ho = (H - 3) // 2 + 1
    Wo = (W - 3) // 2 + 1
    P = Ho * Wo
    Hq, Wq = Ho + 1, Wo + 1

    # Single input layout pass: NCHW -> parity-folded space-to-depth with
    # 4*Cin = 256 channels on lanes (subsumes the NCHW->NHWC transpose).
    x = jnp.transpose(x_nchw, (0, 2, 3, 1))                     # NHWC
    xp = jnp.pad(x, ((0, 0), (0, 2 * Hq - H), (0, 2 * Wq - W), (0, 0)))
    xr = xp.reshape(N, Hq, 2, Wq, 2, Cin)                       # (n,qh,ph,qw,pw,c)
    xr = jnp.transpose(xr, (0, 1, 3, 2, 4, 5)).reshape(N, Hq, Wq, 4 * Cin)

    # PyTorch weight (Cout, Cin, 3, 3) -> per-window tap-merged (4, Cout, 256)
    # with lane index (2*ph + pw)*Cin + c; taps outside 3x3 get zero weights.
    w = params["w"]
    w_pad = jnp.pad(w, ((0, 0), (0, 0), (0, 1), (0, 1)))        # (Cout, Cin, 4, 4)
    wt = w_pad.reshape(Cout, Cin, 2, 2, 2, 2)                   # (o,c,rh,ph,rw,pw)
    wt = jnp.transpose(wt, (2, 4, 0, 3, 5, 1))                  # (rh,rw,o,ph,pw,c)
    w_mat = wt.reshape(4, Cout, 4 * Cin).astype(jnp.bfloat16)

    scale = params["scale"].reshape(Cout, 1).astype(jnp.float32)
    bias = params["bias"].reshape(Cout, 1).astype(jnp.float32)

    flops = 2 * N * P * Cout * (16 * Cin) + N * P * 9 * Cin      # MXU (padded K) + pool
    bytes_accessed = (4 * xr.size + 2 * w_mat.size
                      + 4 * (scale.size + bias.size)
                      + 4 * N * (Cin + Cout) * P)

    out = pl.pallas_call(
        _make_mixed3a_kernel(Ho, Wo, Cin, Cout),
        out_shape=jax.ShapeDtypeStruct((N, Cin + Cout, P), x.dtype),
        grid=(N,),
        in_specs=[
            pl.BlockSpec((1, Hq, Wq, 4 * Cin), lambda n: (n, 0, 0, 0)),
            pl.BlockSpec((4, Cout, 4 * Cin), lambda n: (0, 0, 0)),
            pl.BlockSpec((Cout, 1), lambda n: (0, 0)),
            pl.BlockSpec((Cout, 1), lambda n: (0, 0)),
        ],
        out_specs=pl.BlockSpec((1, Cin + Cout, P), lambda n: (n, 0, 0)),
        compiler_params=pltpu.CompilerParams(
            dimension_semantics=("parallel",),          # dual-TC on v7x
            vmem_limit_bytes=32 * 1024 * 1024),         # << v7x 64 MiB physical
        cost_estimate=pl.CostEstimate(
            flops=flops, transcendentals=0, bytes_accessed=bytes_accessed),
    )(xr, w_mat, scale, bias)

    # Output is already channel-major; only a free reshape remains.
    return out.reshape(N, Cin + Cout, Ho, Wo)                   # NCHW


# --------------------------- params (synthetic) ------------------------------

def init_params(key, cin=64, cout=96):
    """Deterministic synthetic params: conv weight + folded BN scale/bias."""
    k_w, k_g, k_b, k_m, k_v = jax.random.split(key, 5)
    fan_in = cin * 3 * 3
    w = jax.random.normal(k_w, (cout, cin, 3, 3), jnp.float32) / jnp.sqrt(fan_in)
    gamma = 1.0 + 0.1 * jax.random.normal(k_g, (cout,), jnp.float32)
    beta = 0.1 * jax.random.normal(k_b, (cout,), jnp.float32)
    mean = 0.1 * jax.random.normal(k_m, (cout,), jnp.float32)
    var = 1.0 + 0.1 * jnp.abs(jax.random.normal(k_v, (cout,), jnp.float32))
    scale = gamma / jnp.sqrt(var + BN_EPS)                      # fold BN (eval mode)
    bias = beta - mean * scale
    return {"w": w, "scale": scale, "bias": bias}


# ------------------------------ JAX reference --------------------------------

def ref_mixed_3a(x_nchw, params):
    x = jnp.transpose(x_nchw, (0, 2, 3, 1))
    pool = jax.lax.reduce_window(x, -jnp.inf, jax.lax.max,
                                 (1, 3, 3, 1), (1, 2, 2, 1), "VALID")
    w = jnp.transpose(params["w"], (2, 3, 1, 0))                # OIHW -> HWIO
    conv = jax.lax.conv_general_dilated(
        x, w, (2, 2), "VALID",
        dimension_numbers=("NHWC", "HWIO", "NHWC"),
        precision=jax.lax.Precision.HIGHEST)
    conv = jnp.maximum(conv * params["scale"] + params["bias"], 0.0)
    out = jnp.concatenate([pool, conv], axis=-1)
    return jnp.transpose(out, (0, 3, 1, 2))


# ---------------------------------- main -------------------------------------

if __name__ == "__main__":
    key = jax.random.PRNGKey(0)
    k_x, k_p = jax.random.split(key)

    # Mixed_3a takes 64-channel input; small spatial size (17 -> 8 after stride 2).
    N, C, H, W = 2, 64, 17, 17
    x = jax.random.normal(k_x, (N, C, H, W), jnp.float32)
    params = init_params(k_p)

    fwd = jax.jit(mixed_3a_forward)
    out = jax.block_until_ready(fwd(x, params))
    Ho = Wo = (H - 3) // 2 + 1
    assert out.shape == (N, 64 + 96, Ho, Wo), out.shape

    ref = jax.block_until_ready(ref_mixed_3a(x, params))
    # Pool branch is pure f32 data movement + max -> should match exactly.
    pool_err = float(jnp.max(jnp.abs(out[:, :64] - ref[:, :64])))
    # Conv branch uses bf16 MXU operands with f32 accumulation; budget ~1e-2.
    # Any indexing / tap-merge / BN-fold bug produces O(0.1-1) errors and fails.
    conv_err = float(jnp.max(jnp.abs(out[:, 64:] - ref[:, 64:])))
    assert pool_err < 1e-5, f"pool branch mismatch: {pool_err}"
    assert conv_err < 3e-2, f"conv branch error too large: {conv_err}"

    print("KERNEL_OK")
</pallas_src>

<mosaic_0001>
module attributes {stable_mosaic.version = 11 : i64} {
  func.func @kernel(%arg0: i32, %arg1: memref<1x9x9x256xf32, #tpu.memory_space<vmem>>, %arg2: memref<4x96x256xbf16, #tpu.memory_space<vmem>>, %arg3: memref<96x1xf32, #tpu.memory_space<vmem>>, %arg4: memref<96x1xf32, #tpu.memory_space<vmem>>, %arg5: memref<1x160x64xf32, #tpu.memory_space<vmem>>) attributes {dimension_semantics = [#tpu.dimension_semantics<parallel>], iteration_bounds = array<i64: 2>, scalar_prefetch = 0 : i64, scratch_operands = 0 : i64, tpu.core_type = #tpu.core_type<tc>, window_params = [{transform_indices = @transform_0, window_bounds = array<i64: 1, 9, 9, 256>}, {pipeline_mode = #tpu.pipeline_mode<synchronous>, transform_indices = @transform_1, window_bounds = array<i64: 4, 96, 256>}, {pipeline_mode = #tpu.pipeline_mode<synchronous>, transform_indices = @transform_2, window_bounds = array<i64: 96, 1>}, {pipeline_mode = #tpu.pipeline_mode<synchronous>, transform_indices = @transform_3, window_bounds = array<i64: 96, 1>}, {transform_indices = @transform_4, window_bounds = array<i64: 1, 160, 64>}]} {
    %cst = arith.constant 0.000000e+00 : f32
    %0 = vector.broadcast %cst : f32 to vector<96x64xf32>
    %cst_0 = arith.constant 0xFF800000 : f32
    %1 = vector.broadcast %cst_0 : f32 to vector<64x64xf32>
    %c0 = arith.constant 0 : index
    %c0_1 = arith.constant 0 : index
    %c0_2 = arith.constant 0 : index
    %c0_3 = arith.constant 0 : index
    %2 = vector.load %arg1[%c0, %c0_1, %c0_2, %c0_3] : memref<1x9x9x256xf32, #tpu.memory_space<vmem>>, vector<1x8x8x256xf32>
    %3 = vector.shape_cast %2 : vector<1x8x8x256xf32> to vector<8x8x256xf32>
    %4 = vector.shape_cast %3 : vector<8x8x256xf32> to vector<64x256xf32>
    %c0_4 = arith.constant 0 : index
    %c0_5 = arith.constant 0 : index
    %c0_6 = arith.constant 0 : index
    %5 = vector.load %arg2[%c0_4, %c0_5, %c0_6] : memref<4x96x256xbf16, #tpu.memory_space<vmem>>, vector<1x96x256xbf16>
    %6 = vector.shape_cast %5 : vector<1x96x256xbf16> to vector<96x256xbf16>
    %7 = arith.truncf %4 : vector<64x256xf32> to vector<64x256xbf16>
    %cst_7 = arith.constant dense<0.000000e+00> : vector<96x64xf32>
    %8 = tpu.matmul %6, %7, %cst_7 {dimension_numbers = #tpu.dot_dimension_numbers<[1], [1], [0], [0], [0, 0, 1, 0], [], []>} : vector<96x256xbf16>, vector<64x256xbf16>, vector<96x64xf32> -> vector<96x64xf32>
    %9 = arith.addf %0, %8 : vector<96x64xf32>
    %10 = vector.extract_strided_slice %4 {offsets = [0, 0], sizes = [64, 64], strides = [1, 1]} : vector<64x256xf32> to vector<64x64xf32>
    %11 = arith.maximumf %1, %10 : vector<64x64xf32>
    %12 = vector.extract_strided_slice %4 {offsets = [0, 64], sizes = [64, 64], strides = [1, 1]} : vector<64x256xf32> to vector<64x64xf32>
    %13 = arith.maximumf %11, %12 : vector<64x64xf32>
    %14 = vector.extract_strided_slice %4 {offsets = [0, 128], sizes = [64, 64], strides = [1, 1]} : vector<64x256xf32> to vector<64x64xf32>
    %15 = arith.maximumf %13, %14 : vector<64x64xf32>
    %16 = vector.extract_strided_slice %4 {offsets = [0, 192], sizes = [64, 64], strides = [1, 1]} : vector<64x256xf32> to vector<64x64xf32>
    %17 = arith.maximumf %15, %16 : vector<64x64xf32>
    %c0_8 = arith.constant 0 : index
    %c0_9 = arith.constant 0 : index
    %c1 = arith.constant 1 : index
    %c0_10 = arith.constant 0 : index
    %18 = vector.load %arg1[%c0_8, %c0_9, %c1, %c0_10] : memref<1x9x9x256xf32, #tpu.memory_space<vmem>>, vector<1x8x8x256xf32>
    %19 = vector.shape_cast %18 : vector<1x8x8x256xf32> to vector<8x8x256xf32>
    %20 = vector.shape_cast %19 : vector<8x8x256xf32> to vector<64x256xf32>
    %c1_11 = arith.constant 1 : index
    %c0_12 = arith.constant 0 : index
    %c0_13 = arith.constant 0 : index
    %21 = vector.load %arg2[%c1_11, %c0_12, %c0_13] : memref<4x96x256xbf16, #tpu.memory_space<vmem>>, vector<1x96x256xbf16>
    %22 = vector.shape_cast %21 : vector<1x96x256xbf16> to vector<96x256xbf16>
    %23 = arith.truncf %20 : vector<64x256xf32> to vector<64x256xbf16>
    %cst_14 = arith.constant dense<0.000000e+00> : vector<96x64xf32>
    %24 = tpu.matmul %22, %23, %cst_14 {dimension_numbers = #tpu.dot_dimension_numbers<[1], [1], [0], [0], [0, 0, 1, 0], [], []>} : vector<96x256xbf16>, vector<64x256xbf16>, vector<96x64xf32> -> vector<96x64xf32>
    %25 = arith.addf %9, %24 : vector<96x64xf32>
    %26 = vector.extract_strided_slice %20 {offsets = [0, 0], sizes = [64, 64], strides = [1, 1]} : vector<64x256xf32> to vector<64x64xf32>
    %27 = arith.maximumf %17, %26 : vector<64x64xf32>
    %28 = vector.extract_strided_slice %20 {offsets = [0, 128], sizes = [64, 64], strides = [1, 1]} : vector<64x256xf32> to vector<64x64xf32>
    %29 = arith.maximumf %27, %28 : vector<64x64xf32>
    %c0_15 = arith.constant 0 : index
    %c1_16 = arith.constant 1 : index
    %c0_17 = arith.constant 0 : index
    %c0_18 = arith.constant 0 : index
    %30 = vector.load %arg1[%c0_15, %c1_16, %c0_17, %c0_18] : memref<1x9x9x256xf32, #tpu.memory_space<vmem>>, vector<1x8x8x256xf32>
    %31 = vector.shape_cast %30 : vector<1x8x8x256xf32> to vector<8x8x256xf32>
    %32 = vector.shape_cast %31 : vector<8x8x256xf32> to vector<64x256xf32>
    %c2 = arith.constant 2 : index
    %c0_19 = arith.constant 0 : index
    %c0_20 = arith.constant 0 : index
    %33 = vector.load %arg2[%c2, %c0_19, %c0_20] : memref<4x96x256xbf16, #tpu.memory_space<vmem>>, vector<1x96x256xbf16>
    %34 = vector.shape_cast %33 : vector<1x96x256xbf16> to vector<96x256xbf16>
    %35 = arith.truncf %32 : vector<64x256xf32> to vector<64x256xbf16>
    %cst_21 = arith.constant dense<0.000000e+00> : vector<96x64xf32>
    %36 = tpu.matmul %34, %35, %cst_21 {dimension_numbers = #tpu.dot_dimension_numbers<[1], [1], [0], [0], [0, 0, 1, 0], [], []>} : vector<96x256xbf16>, vector<64x256xbf16>, vector<96x64xf32> -> vector<96x64xf32>
    %37 = arith.addf %25, %36 : vector<96x64xf32>
    %38 = vector.extract_strided_slice %32 {offsets = [0, 0], sizes = [64, 64], strides = [1, 1]} : vector<64x256xf32> to vector<64x64xf32>
    %39 = arith.maximumf %29, %38 : vector<64x64xf32>
    %40 = vector.extract_strided_slice %32 {offsets = [0, 64], sizes = [64, 64], strides = [1, 1]} : vector<64x256xf32> to vector<64x64xf32>
    %41 = arith.maximumf %39, %40 : vector<64x64xf32>
    %c0_22 = arith.constant 0 : index
    %c1_23 = arith.constant 1 : index
    %c1_24 = arith.constant 1 : index
    %c0_25 = arith.constant 0 : index
    %42 = vector.load %arg1[%c0_22, %c1_23, %c1_24, %c0_25] : memref<1x9x9x256xf32, #tpu.memory_space<vmem>>, vector<1x8x8x256xf32>
    %43 = vector.shape_cast %42 : vector<1x8x8x256xf32> to vector<8x8x256xf32>
    %44 = vector.shape_cast %43 : vector<8x8x256xf32> to vector<64x256xf32>
    %c3 = arith.constant 3 : index
    %c0_26 = arith.constant 0 : index
    %c0_27 = arith.constant 0 : index
    %45 = vector.load %arg2[%c3, %c0_26, %c0_27] : memref<4x96x256xbf16, #tpu.memory_space<vmem>>, vector<1x96x256xbf16>
    %46 = vector.shape_cast %45 : vector<1x96x256xbf16> to vector<96x256xbf16>
    %47 = arith.truncf %44 : vector<64x256xf32> to vector<64x256xbf16>
    %cst_28 = arith.constant dense<0.000000e+00> : vector<96x64xf32>
    %48 = tpu.matmul %46, %47, %cst_28 {dimension_numbers = #tpu.dot_dimension_numbers<[1], [1], [0], [0], [0, 0, 1, 0], [], []>} : vector<96x256xbf16>, vector<64x256xbf16>, vector<96x64xf32> -> vector<96x64xf32>
    %49 = arith.addf %37, %48 : vector<96x64xf32>
    %50 = vector.extract_strided_slice %44 {offsets = [0, 0], sizes = [64, 64], strides = [1, 1]} : vector<64x256xf32> to vector<64x64xf32>
    %51 = arith.maximumf %41, %50 : vector<64x64xf32>
    %c0_29 = arith.constant 0 : index
    %c0_30 = arith.constant 0 : index
    %52 = vector.load %arg3[%c0_29, %c0_30] : memref<96x1xf32, #tpu.memory_space<vmem>>, vector<96x1xf32>
    %53 = vector.broadcast %52 : vector<96x1xf32> to vector<96x64xf32>
    %54 = arith.mulf %49, %53 : vector<96x64xf32>
    %c0_31 = arith.constant 0 : index
    %c0_32 = arith.constant 0 : index
    %55 = vector.load %arg4[%c0_31, %c0_32] : memref<96x1xf32, #tpu.memory_space<vmem>>, vector<96x1xf32>
    %56 = vector.broadcast %55 : vector<96x1xf32> to vector<96x64xf32>
    %57 = arith.addf %54, %56 : vector<96x64xf32>
    %cst_33 = arith.constant 0.000000e+00 : f32
    %58 = vector.broadcast %cst_33 : f32 to vector<96x64xf32>
    %59 = arith.maximumf %57, %58 : vector<96x64xf32>
    %60 = tpu.transpose %51, [1, 0] : vector<64x64xf32> -> vector<64x64xf32>
    %c0_34 = arith.constant 0 : index
    %c0_35 = arith.constant 0 : index
    %c0_36 = arith.constant 0 : index
    %61 = vector.load %arg5[%c0_34, %c0_35, %c0_36] : memref<1x160x64xf32, #tpu.memory_space<vmem>>, vector<1x64x64xf32>
    %62 = vector.shape_cast %61 : vector<1x64x64xf32> to vector<64x64xf32>
    %63 = vector.shape_cast %60 : vector<64x64xf32> to vector<1x64x64xf32>
    tpu.vector_store %arg5[%c0_34, %c0_35, %c0_36], %63 {strides = array<i32>} : memref<1x160x64xf32, #tpu.memory_space<vmem>>, vector<1x64x64xf32>,
    %c0_37 = arith.constant 0 : index
    %c64 = arith.constant 64 : index
    %c0_38 = arith.constant 0 : index
    %64 = vector.load %arg5[%c0_37, %c64, %c0_38] : memref<1x160x64xf32, #tpu.memory_space<vmem>>, vector<1x96x64xf32>
    %65 = vector.shape_cast %64 : vector<1x96x64xf32> to vector<96x64xf32>
    %66 = vector.shape_cast %59 : vector<96x64xf32> to vector<1x96x64xf32>
    tpu.vector_store %arg5[%c0_37, %c64, %c0_38], %66 {strides = array<i32>} : memref<1x160x64xf32, #tpu.memory_space<vmem>>, vector<1x96x64xf32>,
    return
  }
  func.func @transform_0(%arg0: i32) -> (i32, i32, i32, i32) {
    %c0_i32 = arith.constant 0 : i32
    %c0_i32_0 = arith.constant 0 : i32
    %c0_i32_1 = arith.constant 0 : i32
    %c0_i32_2 = arith.constant 0 : i32
    return %arg0, %c0_i32, %c0_i32_0, %c0_i32_1 : i32, i32, i32, i32
  }
  func.func @transform_1(%arg0: i32) -> (i32, i32, i32) {
    %c0_i32 = arith.constant 0 : i32
    %c0_i32_0 = arith.constant 0 : i32
    %c0_i32_1 = arith.constant 0 : i32
    %c0_i32_2 = arith.constant 0 : i32
    return %c0_i32, %c0_i32_0, %c0_i32_1 : i32, i32, i32
  }
  func.func @transform_2(%arg0: i32) -> (i32, i32) {
    %c0_i32 = arith.constant 0 : i32
    %c0_i32_0 = arith.constant 0 : i32
    %c0_i32_1 = arith.constant 0 : i32
    return %c0_i32, %c0_i32_0 : i32, i32
  }
  func.func @transform_3(%arg0: i32) -> (i32, i32) {
    %c0_i32 = arith.constant 0 : i32
    %c0_i32_0 = arith.constant 0 : i32
    %c0_i32_1 = arith.constant 0 : i32
    return %c0_i32, %c0_i32_0 : i32, i32
  }
  func.func @transform_4(%arg0: i32) -> (i32, i32, i32) {
    %c0_i32 = arith.constant 0 : i32
    %c0_i32_0 = arith.constant 0 : i32
    %c0_i32_1 = arith.constant 0 : i32
    return %arg0, %c0_i32, %c0_i32_0 : i32, i32, i32
  }
}

</mosaic_0001>

<bundles_post_ra>
// kernel: mixed_3a_forward.1
= control target key start
LH: loop header
LB: loop body
LE: loop exit
PB: predicated region body
PF: predicated region fallthrough
CT: control target
= control target key end

     0   :  { %s1931_s15 = smov 0   ;;  %s2595_s0 = inlined_call_operand.vmem [shape: f32[2,9,9,256], index: 0, kind: input, shape index: {}]   ;;  %s2596_s1 = inlined_call_operand.vmem [shape: bf16[4,96,256], index: 1, kind: input, shape index: {}]   ;;  %s2597_s2 = inlined_call_operand.vmem [shape: f32[96,1], index: 2, kind: input, shape index: {}]   ;;  %s2598_s3 = inlined_call_operand.vmem [shape: f32[96,1], index: 3, kind: input, shape index: {}]   ;;  %s2599_s4 = inlined_call_operand.vmem [shape: f32[2,160,64], index: 4, kind: output, shape index: {}]  }
   0x1 LB: > { %s1608_s16 = sadd.s32 4294967295, %s1902_s15   ;;  %p1612_p0 = scmp.ge.s32.totalorder %s1902_s15, 1  ;;  %s1902_s15 = sphi %s1931_s15, %s14_s15  }
   0x2   : > { %p162_p1 = scmp.lt.s32.totalorder %s1902_s15, 3 }
   0x4   : > { %p163_p2 = pnand %p1612_p0, %p162_p1 }
   0x5   : > { %p188_p3 = scmp.lt.s32.totalorder (!%p163_p2), %s1608_s16, 1  ;;  %v1826_v0 = vld [vmem:[%s2596_s1 + $0xc4] ss:$8 sps:$4 sm:$0xff] (!%p163_p2)   ;;  %v1904_v2 = vmov (!%p163_p2), 0   ;;  %vm387_vm0 = vcmask (!%p163_p2), 1046528   ;;  %s1905_s25 = smov (!%p163_p2), 64  }
   0x6   : > { %166 = sbr.rel (%p163_p2) target bundleno = 369 (0x171), region = 36  ;;  %v1829_v1 = vld [vmem:[%s2596_s1 + $0x64] ss:$8 sps:$4 sm:$0xff] (!%p163_p2)   ;;  %1823 = vset.pattern.permute.xlu1 (!%p163_p2), %v1904_v2  ;;  %1822 = vset.pattern.permute.xlu0 (!%p163_p2), %v1904_v2  ;;  %vm1532_vm1 = vcmask (!%p163_p2), 523264  }
   0x7   : > { %901 = vmatprep.mubr.bf16.mxu0 (!%p163_p2), %v1826_v0  ;;  %565 = vmatprep.mubr.bf16.mxu1 (!%p163_p2), %v1829_v1 }
   0xd   : > { %s2601_s16 = smov (!%p188_p3, %s1608_s16), 1 }
   0xe   : > { %s1809_s21 = smul.u32 288, %s2601_s16 }
   0xf   : > { %s1810_s22 = smul.u32 160, %s2601_s16 }
  0x10   : > { %s1951_s24 = scalar_lea.vmem %s2595_s0, %s1809_s21 }
  0x11   : > { %v1954_v3 = vld [vmem:[%s1951_s24 + $0x28] sm:$0xff]  ;;  %v1960_v5 = vld [vmem:[%s1951_s24 + $0x20] sm:$0xff]  ;;  %v326_v9 = vld [vmem:[%s1951_s24 + $0x18] sm:$0x1]  ;;  %s2532_s26 = scalar_lea.vmem %s2599_s4, %s1810_s22 }
  0x12   : > { %v1957_v4 = vld [vmem:[%s1951_s24 + $0x48] sm:$0xff]  ;;  %v1965_v7 = vld [vmem:[%s1951_s24 + $0x40] sm:$0xff]  ;;  %v330_v12 = vld [vmem:[%s1951_s24 + $0x38] sm:$0x1]  ;;  %v392_v14 = vrot.slane %v326_v9, 1 }
  0x13   : > { %v802_v6 = vpack.c.bf16 %v1957_v4, %v1954_v3  ;;  %v324_v8 = vld [vmem:[%s1951_s24 + $0x8] sm:$0xfe]  ;;  %v801_v10 = vpack.c.bf16 %v1965_v7, %v1960_v5  ;;  %247 = vrot.lane.b32.xlu1 %v1965_v7, %s1905_s25  ;;  %v398_v16 = vrot.slane %v330_v12, 1  ;;  %v323_v17 = vld [vmem:[%s1951_s24] sm:$0xfe] }
  0x14   : > { %v328_v11 = vld [vmem:[%s1951_s24 + $0x28] sm:$0xfe]  ;;  %v391_v13 = vrot.slane %v324_v8, 1  ;;  %v325_v18 = vld [vmem:[%s1951_s24 + $0x10] sm:$0x1]  ;;  %v388_v22 = vrot.slane %v323_v17, 1 }
  0x15   : > { %869 = vmatprep.subr.bf16.mxu0 %v802_v6  ;;  %v397_v15 = vrot.slane %v328_v11, 1  ;;  %v327_v20 = vld [vmem:[%s1951_s24 + $0x20] sm:$0xfe]  ;;  %v329_v21 = vld [vmem:[%s1951_s24 + $0x30] sm:$0x1]  ;;  %v389_v23 = vrot.slane %v325_v18, 1 }
  0x16   : > { %870 = vmatpush1.bf16.xpose.msra.mxu0 %v801_v10  ;;  %v1978_v19 = vsel %vm387_vm0, %v391_v13, %v392_v14  ;;  %v394_v25 = vrot.slane %v327_v20, 1  ;;  %v395_v26 = vrot.slane %v329_v21, 1  ;;  %v1986_v27 = vld [vmem:[%s1951_s24] sm:$0xff]  ;;  %v1989_v28 = vld [vmem:[%s1951_s24 + $0x68] sm:$0xff]  ;;  %v334_v38 = vld [vmem:[%s1951_s24 + $0x58] sm:$0x1] }
  0x17   : > { %v1983_v24 = vsel %vm387_vm0, %v397_v15, %v398_v16  ;;  %v1992_v29 = vld [vmem:[%s1951_s24 + $0x88] sm:$0xff]  ;;  %v1997_v31 = vsel %vm387_vm0, %v388_v22, %v389_v23  ;;  %243 = vrot.lane.b32.xlu0 %v1986_v27, %s1905_s25  ;;  %v2004_v33 = vld [vmem:[%s1951_s24 + $0x60] sm:$0xff]  ;;  %v338_v40 = vld [vmem:[%s1951_s24 + $0x78] sm:$0x1]  ;;  %v404_v43 = vrot.slane %v334_v38, 1 }
  0x18   : > { %v466_v30 = vpack.c.bf16 %v1983_v24, %v1978_v19  ;;  %v804_v32 = vpack.c.bf16 %v1992_v29, %v1989_v28  ;;  %v2007_v34 = vld [vmem:[%s1951_s24 + $0x80] sm:$0xff]  ;;  %v332_v35 = vld [vmem:[%s1951_s24 + $0x48] sm:$0xfe]  ;;  %v2011_v36 = vsel %vm387_vm0, %v394_v25, %v395_v26  ;;  %249 = vrot.lane.b32.xlu1 %v2004_v33, %s1905_s25  ;;  %v410_v47 = vrot.slane %v338_v40, 1  ;;  %v333_v48 = vld [vmem:[%s1951_s24 + $0x50] sm:$0x1] }
  0x19   : > { %v803_v37 = vpack.c.bf16 %v2007_v34, %v2004_v33  ;;  %v336_v39 = vld [vmem:[%s1951_s24 + $0x68] sm:$0xfe]  ;;  %v465_v41 = vpack.c.bf16 %v2011_v36, %v1997_v31  ;;  %v403_v42 = vrot.slane %v332_v35, 1  ;;  %v331_v45 = vld [vmem:[%s1951_s24 + $0x40] sm:$0xfe]  ;;  %v401_v53 = vrot.slane %v333_v48, 1 }
  0x1a   : > { %533 = vmatprep.subr.bf16.mxu1 %v466_v30  ;;  %871 = vmatprep.subr.bf16.mxu0 %v804_v32  ;;  %v409_v44 = vrot.slane %v336_v39, 1  ;;  %v2024_v46 = vld [vmem:[%s1951_s24 + $0xa8] sm:$0xff]  ;;  %v335_v49 = vld [vmem:[%s1951_s24 + $0x60] sm:$0xfe]  ;;  %v400_v50 = vrot.slane %v331_v45, 1 }
  0x1b   : > { %534 = vmatpush1.bf16.xpose.msra.mxu1 %v465_v41  ;;  %245 = vrot.lane.b32.xlu0 %v1960_v5, %s1905_s25  ;;  %v2031_v51 = vsel %vm387_vm0, %v403_v42, %v404_v43  ;;  %v337_v52 = vld [vmem:[%s1951_s24 + $0x70] sm:$0x1]  ;;  %v406_v54 = vrot.slane %v335_v49, 1  ;;  %v2035_v55 = vld [vmem:[%s1951_s24 + $0xc8] sm:$0xff]  ;;  %v2038_v56 = vld [vmem:[%s1951_s24 + $0xa0] sm:$0xff] }
  0x1c   : > { %v2041_v57 = vsel %vm387_vm0, %v409_v44, %v410_v47  ;;  %v407_v58 = vrot.slane %v337_v52, 1  ;;  %v806_v59 = vpack.c.bf16 %v2035_v55, %v2024_v46  ;;  %253 = vrot.lane.b32.xlu1 %v2038_v56, %s1905_s25  ;;  %v340_v60 = vld [vmem:[%s1951_s24 + $0x88] sm:$0xfe]  ;;  %v342_v61 = vld [vmem:[%s1951_s24 + $0x98] sm:$0x1]  ;;  %v2052_v63 = vsel %vm387_vm0, %v400_v50, %v401_v53  ;;  %v2057_v6 = vld [vmem:[%s1951_s24 + $0xe0] sm:$0xff] }
  0x1d   : > { %v468_v62 = vpack.c.bf16 %v2041_v57, %v2031_v51  ;;  %v344_v0 = vld [vmem:[%s1951_s24 + $0xa8] sm:$0xfe]  ;;  %v346_v1 = vld [vmem:[%s1951_s24 + $0xb8] sm:$0x1]  ;;  %v415_v2 = vrot.slane %v340_v60, 1  ;;  %v2063_v9 = vld [vmem:[%s1951_s24 + $0xc0] sm:$0xff] }
  0x1e   : > { %872 = vmatpush1.bf16.xpose.msra.mxu0 %v803_v37  ;;  %v2060_v8 = vsel %vm387_vm0, %v406_v54, %v407_v58  ;;  %v416_v10 = vrot.slane %v342_v61, 1  ;;  %v421_v11 = vrot.slane %v344_v0, 1  ;;  %v422_v12 = vrot.slane %v346_v1, 1  ;;  %v339_v13 = vld [vmem:[%s1951_s24 + $0x80] sm:$0xfe]  ;;  %v2082_v23 = vld [vmem:[%s1951_s24 + $0xe8] sm:$0xff] }
  0x1f   : > { %873 = vmatprep.subr.bf16.mxu0 %v806_v59  ;;  %535 = vmatprep.subr.bf16.mxu1 %v468_v62  ;;  %v467_v14 = vpack.c.bf16 %v2060_v8, %v2052_v63  ;;  %v341_v15 = vld [vmem:[%s1951_s24 + $0x90] sm:$0x1]  ;;  %v343_v16 = vld [vmem:[%s1951_s24 + $0xa0] sm:$0xfe]  ;;  %v412_v21 = vrot.slane %v339_v13, 1  ;;  %v1666_v25 = vld [vmem:[%s1951_s24 + $0x108] sm:$0xff]  ;;  %v805_v26 = vpack.c.bf16 %v2063_v9, %v2038_v56 }
  0x20   : > { %251 = vrot.lane.b32.xlu0 %v2007_v34, %s1905_s25  ;;  %v345_v17 = vld [vmem:[%s1951_s24 + $0xb0] sm:$0x1]  ;;  %v2074_v18 = vsel %vm387_vm0, %v415_v2, %v416_v10  ;;  %v2077_v20 = vsel %vm387_vm0, %v421_v11, %v422_v12  ;;  %v413_v22 = vrot.slane %v341_v15, 1  ;;  %257 = vrot.lane.b32.xlu1 %v2057_v6, %s1905_s25  ;;  %v418_v32 = vrot.slane %v343_v16, 1  ;;  %v348_v37 = vld [vmem:[%s1951_s24 + $0xc8] sm:$0xfe] }
  0x21   : > { %v470_v30 = vpack.c.bf16 %v2077_v20, %v2074_v18  ;;  %v419_v35 = vrot.slane %v345_v17, 1  ;;  %v350_v38 = vld [vmem:[%s1951_s24 + $0xd8] sm:$0x1]  ;;  %v2092_v39 = vld [vmem:[%s1951_s24 + $0x8] sm:$0xff]  ;;  %v808_v40 = vpack.c.bf16 %v1666_v25, %v2082_v23  ;;  %v427_v43 = vrot.slane %v348_v37, 1  ;;  %v2108_v53 = vld [vmem:[%s1951_s24 + $0x100] sm:$0xff] }
  0x22   : > { %v352_v41 = vld [vmem:[%s1951_s24 + $0xe8] sm:$0xfe]  ;;  %v354_v42 = vld [vmem:[%s1951_s24 + $0xf8] sm:$0x1]  ;;  %v428_v44 = vrot.slane %v350_v38, 1  ;;  %v2102_v50 = vsel %vm387_vm0, %v412_v21, %v413_v22 }
  0x23   : > { %536 = vmatpush1.bf16.xpose.msra.mxu1 %v467_v14  ;;  %v433_v45 = vrot.slane %v352_v41, 1  ;;  %v434_v47 = vrot.slane %v354_v42, 1  ;;  %v347_v48 = vld [vmem:[%s1951_s24 + $0xc0] sm:$0xfe]  ;;  %v349_v49 = vld [vmem:[%s1951_s24 + $0xd0] sm:$0x1]  ;;  %v2105_v52 = vsel %vm387_vm0, %v418_v32, %v419_v35  ;;  %v807_v35 = vpack.c.bf16 %v2108_v53, %v2057_v6 }
  0x24   : > { %255 = vrot.lane.b32.xlu0 %v2063_v9, %s1905_s25  ;;  %537 = vmatprep.subr.bf16.mxu1 %v470_v30  ;;  %v351_v54 = vld [vmem:[%s1951_s24 + $0xe0] sm:$0xfe]  ;;  %v353_v58 = vld [vmem:[%s1951_s24 + $0xf0] sm:$0x1]  ;;  %v2115_v59 = vsel %vm387_vm0, %v427_v43, %v428_v44  ;;  %v424_v61 = vrot.slane %v347_v48, 1  ;;  %v425_v62 = vrot.slane %v349_v49, 1  ;;  %v469_v13 = vpack.c.bf16 %v2105_v52, %v2102_v50 }
  0x25   : > { %293 = vrot.lane.b32.xlu1 %v1954_v3, %s1905_s25  ;;  %v2118_v60 = vsel %vm387_vm0, %v433_v45, %v434_v47  ;;  %v1692_v0 = vld [vmem:[%s1951_s24 + $0x28] sm:$0xfe]  ;;  %v1694_v1 = vld [vmem:[%s1951_s24 + $0x38] sm:$0x1]  ;;  %v1691_v16 = vld [vmem:[%s1951_s24 + $0x20] sm:$0xfe] }
  0x26   : > { %874 = vmatpush1.bf16.xpose.msra.mxu0 %v805_v26  ;;  %v1696_v2 = vld [vmem:[%s1951_s24 + $0x48] sm:$0xfe]  ;;  %v1698_v10 = vld [vmem:[%s1951_s24 + $0x58] sm:$0x1]  ;;  %v1077_v11 = vrot.slane %v1692_v0, 1  ;;  %v1078_v12 = vrot.slane %v1694_v1, 1  ;;  %v472_v21 = vpack.c.bf16 %v2118_v60, %v2115_v59  ;;  %v2147_v1 = vsel %vm387_vm0, %v424_v61, %v425_v62 }
  0x27   : > { %875 = vmatprep.subr.bf16.mxu0 %v808_v40  ;;  %v1083_v14 = vrot.slane %v1696_v2, 1  ;;  %v1084_v15 = vrot.slane %v1698_v10, 1  ;;  %v1693_v17 = vld [vmem:[%s1951_s24 + $0x30] sm:$0x1]  ;;  %v430_v22 = vrot.slane %v351_v54, 1  ;;  %v431_v25 = vrot.slane %v353_v58, 1 }
  0x28   : > { %291 = vrot.lane.b32.xlu0 %v2092_v39, %s1905_s25  ;;  %v1079_v26 = vsel %vm387_vm0, %v1077_v11, %v1078_v12  ;;  %v1695_v30 = vld [vmem:[%s1951_s24 + $0x40] sm:$0xfe]  ;;  %v1697_v32 = vld [vmem:[%s1951_s24 + $0x50] sm:$0x1]  ;;  %v1074_v38 = vrot.slane %v1691_v16, 1  ;;  %v1075_v40 = vrot.slane %v1693_v17, 1  ;;  %v228_v17 = vpack.c.bf16 %v1954_v3, %v2092_v39 }
  0x29   : > { %297 = vrot.lane.b32.xlu1 %v1989_v28, %s1905_s25  ;;  %v1085_v37 = vsel %vm387_vm0, %v1083_v14, %v1084_v15  ;;  %v1700_v41 = vld [vmem:[%s1951_s24 + $0x68] sm:$0xfe]  ;;  %v1702_v42 = vld [vmem:[%s1951_s24 + $0x78] sm:$0x1]  ;;  %v1080_v44 = vrot.slane %v1695_v30, 1  ;;  %v1081_v45 = vrot.slane %v1697_v32, 1  ;;  %v2150_v2 = vsel %vm387_vm0, %v430_v22, %v431_v25 }
  0x2a   : > { %v1152_v43 = vpack.c.bf16 %v1085_v37, %v1079_v26  ;;  %v1704_v47 = vld [vmem:[%s1951_s24 + $0x88] sm:$0xfe]  ;;  %v1706_v48 = vld [vmem:[%s1951_s24 + $0x98] sm:$0x1]  ;;  %v1089_v49 = vrot.slane %v1700_v41, 1  ;;  %v1090_v54 = vrot.slane %v1702_v42, 1  ;;  %v2158_v11 = vsel %vm387_vm0, %v1074_v38, %v1075_v40 }
  0x2b   : > { %538 = vmatpush1.bf16.xpose.msra.mxu1 %v469_v13  ;;  %v1095_v58 = vrot.slane %v1704_v47, 1  ;;  %v1096_v0 = vrot.slane %v1706_v48, 1  ;;  %v1824_v10 = vld [vmem:[%s2596_s1 + $0xc0] ss:$8 sps:$4 sm:$0xff]   ;;  %v2161_v61 = vsel %vm387_vm0, %v1080_v44, %v1081_v45  ;;  %v471_v12 = vpack.c.bf16 %v2150_v2, %v2147_v1  ;;  %v1830_v13 = vld [vmem:[%s2596_s1 + $0xd4] ss:$8 sps:$4 sm:$0xff]  }
  0x2c   : > { %295 = vrot.lane.b32.xlu0 %v1957_v4, %s1905_s25  ;;  %539 = vmatprep.subr.bf16.mxu1 %v472_v21  ;;  %v1699_v62 = vld [vmem:[%s1951_s24 + $0x60] sm:$0xfe]  ;;  %v1091_v14 = vsel %vm387_vm0, %v1089_v49, %v1090_v54  ;;  %v1701_v16 = vld [vmem:[%s1951_s24 + $0x70] sm:$0x1]  ;;  %v1708_v25 = vld [vmem:[%s1951_s24 + $0xa8] sm:$0xfe]  ;;  %v1151_v26 = vpack.c.bf16 %v2161_v61, %v2158_v11 }
  0x2d   : > { %301 = vrot.lane.b32.xlu1 %v2024_v46, %s1905_s25  ;;  %v1097_v15 = vsel %vm387_vm0, %v1095_v58, %v1096_v0  ;;  %v1703_v21 = vld [vmem:[%s1951_s24 + $0x80] sm:$0xfe]  ;;  %v1705_v22 = vld [vmem:[%s1951_s24 + $0x90] sm:$0x1]  ;;  %v1710_v30 = vld [vmem:[%s1951_s24 + $0xb8] sm:$0x1]  ;;  %v227_v58 = vpack.c.bf16 %v1960_v5, %v1986_v27 }
  0x2e   : > { %876 = vmatpush1.bf16.xpose.msra.mxu0 %v807_v35  ;;  %v1712_v32 = vld [vmem:[%s1951_s24 + $0xc8] sm:$0xfe]  ;;  %v1714_v35 = vld [vmem:[%s1951_s24 + $0xd8] sm:$0x1]  ;;  %v1154_v37 = vpack.c.bf16 %v1097_v15, %v1091_v14  ;;  %v1086_v38 = vrot.slane %v1699_v62, 1  ;;  %v1087_v40 = vrot.slane %v1701_v16, 1 }
  0x2f   : > { %1219 = vmatprep.subr.bf16.mxu0 %v1152_v43  ;;  %v1092_v41 = vrot.slane %v1703_v21, 1  ;;  %v1093_v42 = vrot.slane %v1705_v22, 1  ;;  %v1101_v43 = vrot.slane %v1708_v25, 1  ;;  %v1102_v44 = vrot.slane %v1710_v30, 1  ;;  %v1827_v48 = vld [vmem:[%s2596_s1 + $0x60] ss:$8 sps:$4 sm:$0xff]  }
  0x30   : > { %299 = vrot.lane.b32.xlu0 %v1992_v29, %s1905_s25  ;;  %v1107_v45 = vrot.slane %v1712_v32, 1  ;;  %v1108_v47 = vrot.slane %v1714_v35, 1  ;;  %v1832_v49 = vld [vmem:[%s2596_s1 + $0xd0] ss:$8 sps:$4 sm:$0xff]   ;;  %v1833_v54 = vld [vmem:[%s2596_s1 + $0x74] ss:$8 sps:$4 sm:$0xff]   ;;  %v230_v21 = vpack.c.bf16 %v1989_v28, %v1957_v4 }
  0x31   : > { %305 = vrot.lane.b32.xlu1 %v2082_v23, %s1905_s25  ;;  %v1836_v0 = vld [vmem:[%s2596_s1 + $0xe4] ss:$8 sps:$4 sm:$0xff]   ;;  %v2210_v62 = vsel %vm387_vm0, %v1092_v41, %v1093_v42  ;;  %v1103_v15 = vsel %vm387_vm0, %v1101_v43, %v1102_v44  ;;  %v1718_v25 = vld [vmem:[%s1951_s24 + $0xf8] sm:$0x1] }
  0x32   : > { %v1711_v14 = vld [vmem:[%s1951_s24 + $0xc0] sm:$0xfe]  ;;  %v1109_v16 = vsel %vm387_vm0, %v1107_v45, %v1108_v47  ;;  %v1716_v22 = vld [vmem:[%s1951_s24 + $0xe8] sm:$0xfe]  ;;  %v1722_v35 = vld [vmem:[%s1951_s24 + $0x118] sm:$0x1] }
  0x33   : > { %540 = vmatpush1.bf16.xpose.msra.mxu1 %v471_v12  ;;  %v1707_v12 = vld [vmem:[%s1951_s24 + $0xa0] sm:$0xfe]  ;;  %v1113_v42 = vrot.slane %v1716_v22, 1  ;;  %v1114_v43 = vrot.slane %v1718_v25, 1  ;;  %v1120_v45 = vrot.slane %v1722_v35, 1 }
  0x34   : > { %303 = vrot.lane.b32.xlu0 %v2035_v55, %s1905_s25  ;;  %674 = vmatprep.subr.bf16.mxu1 %v228_v17  ;;  %v1713_v17 = vld [vmem:[%s1951_s24 + $0xd0] sm:$0x1]  ;;  %v1098_v32 = vrot.slane %v1707_v12, 1  ;;  %v1842_v22 = vld [vmem:[%s2596_s1 + $0xf4] ss:$8 sps:$4 sm:$0xff]  }
  0x35   : > { %902 = vmatmul.mubr.bf16.vlgmr.msra.gmra.mrb[0].mxu0 %v1824_v10  ;;  %980 = vrot.lane.b32.xlu1 %v1965_v7, %s1905_s25  ;;  %v2207_v10 = vsel %vm387_vm0, %v1086_v38, %v1087_v40  ;;  %v1104_v40 = vrot.slane %v1711_v14, 1  ;;  %v1105_v41 = vrot.slane %v1713_v17, 1  ;;  %v1835_v47 = vld [vmem:[%s2596_s1 + $0x70] ss:$8 sps:$4 sm:$0xff]   ;;  %v1719_v14 = vld [vmem:[%s1951_s24 + $0x100] sm:$0xfe] }
  0x36   : > { %1220 = vmatpush1.bf16.xpose.msra.mxu0 %v1151_v26  ;;  %909 = vmatprep.mubr.bf16.mxu0 %v1830_v13  ;;  %v1709_v13 = vld [vmem:[%s1951_s24 + $0xb0] sm:$0x1]  ;;  %v1720_v26 = vld [vmem:[%s1951_s24 + $0x108] sm:$0xfe]  ;;  %v1153_v30 = vpack.c.bf16 %v2210_v62, %v2207_v10 }
  0x37   : > { %1221 = vmatprep.subr.bf16.mxu0 %v1154_v37  ;;  %v1156_v37 = vpack.c.bf16 %v1109_v16, %v1103_v15  ;;  %v1099_v38 = vrot.slane %v1709_v13, 1  ;;  %v1119_v44 = vrot.slane %v1720_v26, 1  ;;  %v2248_v12 = vsel %vm387_vm0, %v1104_v40, %v1105_v41  ;;  %v1717_v13 = vld [vmem:[%s1951_s24 + $0xf0] sm:$0x1]  ;;  %v1841_v40 = vld [vmem:[%s2596_s1 + $0x80] ss:$8 sps:$4 sm:$0xff]  }
  0x38   : > { %978 = vrot.lane.b32.xlu0 %v1960_v5, %s1905_s25  ;;  %v232_v15 = vpack.c.bf16 %v2024_v46, %v1992_v29  ;;  %v1115_v16 = vsel %vm387_vm0, %v1113_v42, %v1114_v43  ;;  %v1111_v35 = vrot.slane %v1717_v13, 1  ;;  %v1845_v41 = vld [vmem:[%s2596_s1 + $0x94] ss:$8 sps:$4 sm:$0xff]   ;;  %v231_v42 = vpack.c.bf16 %v2038_v56, %v2007_v34  ;;  %v1847_v13 = vld [vmem:[%s2596_s1 + $0x90] ss:$8 sps:$4 sm:$0xff]  }
  0x39   : > { %984 = vrot.lane.b32.xlu1 %v2007_v34, %s1905_s25  ;;  %v1121_v17 = vsel %vm387_vm0, %v1119_v44, %v1120_v45  ;;  %v1322_v43 = vld [vmem:[%s2597_s2 + $0x10] sm:$0xff] }
  0x3a   : > { %566 = vmatmul.mubr.bf16.vlgmr.msra.gmra.mrb[0].mxu1 %v1827_v48  ;;  %v1838_v48 = vld [vmem:[%s2596_s1 + $0xe0] ss:$8 sps:$4 sm:$0xff]  }
  0x3b   : > { %675 = vmatpush1.bf16.xpose.msra.mxu1 %v227_v58  ;;  %573 = vmatprep.mubr.bf16.mxu1 %v1833_v54  ;;  %v1715_v54 = vld [vmem:[%s1951_s24 + $0xe0] sm:$0xfe]  ;;  %v229_v58 = vpack.c.bf16 %v2004_v33, %v1965_v7 }
  0x3c   : > { %982 = vrot.lane.b32.xlu0 %v2004_v33, %s1905_s25  ;;  %676 = vmatprep.subr.bf16.mxu1 %v230_v21  ;;  %v1721_v21 = vld [vmem:[%s1951_s24 + $0x110] sm:$0x1]  ;;  %v1110_v26 = vrot.slane %v1715_v54, 1 }
  0x3d   : > { %910 = vmatmul.mubr.bf16.gmra.mrb[4].mxu0 %v1832_v49  ;;  %v1839_v49 = vld [vmem:[%s2596_s1 + $0x84] ss:$8 sps:$4 sm:$0xff]   ;;  %988 = vrot.lane.b32.xlu1 %v2063_v9, %s1905_s25 }
  0x3e   : > { %917 = vmatprep.mubr.bf16.mxu0 %v1836_v0  ;;  %1222 = vmatpush1.bf16.xpose.msra.mxu0 %v1153_v30  ;;  %v2245_v0 = vsel %vm387_vm0, %v1098_v32, %v1099_v38  ;;  %v1321_v30 = vld [vmem:[%s2597_s2 + $0x8] sm:$0xff]  ;;  %v1158_v32 = vpack.c.bf16 %v1121_v17, %v1115_v16  ;;  %v1117_v38 = vrot.slane %v1721_v21, 1  ;;  %v2283_v44 = vsel %vm387_vm0, %v1110_v26, %v1111_v35  ;;  %v1326_v16 = vld [vmem:[%s2597_s2 + $0x30] sm:$0xff]  ;;  %v1323_v26 = vld [vmem:[%s2597_s2 + $0x18] sm:$0xff] }
  0x3f   : > { %1223 = vmatprep.subr.bf16.mxu0 %v1156_v37  ;;  %v1155_v25 = vpack.c.bf16 %v2248_v12, %v2245_v0  ;;  %v1116_v37 = vrot.slane %v1719_v14, 1  ;;  %v233_v14 = vpack.c.bf16 %v2057_v6, %v2063_v9  ;;  %v1850_v17 = vld [vmem:[%s2596_s1 + $0x100] ss:$8 sps:$4 sm:$0xff]   ;;  %v1854_v21 = vld [vmem:[%s2596_s1 + $0x114] ss:$8 sps:$4 sm:$0xff]  }
  0x40   : > { %986 = vrot.lane.b32.xlu0 %v2038_v56, %s1905_s25  ;;  %v1330_v35 = vld [vmem:[%s2597_s2 + $0x50] sm:$0xff] }
  0x41   : > { %992 = vrot.lane.b32.xlu1 %v2108_v53, %s1905_s25  ;;  %v2286_v45 = vsel %vm387_vm0, %v1116_v37, %v1117_v38  ;;  %v1856_v37 = vld [vmem:[%s2596_s1 + $0x110] ss:$8 sps:$4 sm:$0xff]   ;;  %v1862_v38 = vld [vmem:[%s2596_s1 + $0x124] ss:$8 sps:$4 sm:$0xff]  }
  0x42   : > { %574 = vmatmul.mubr.bf16.gmra.mrb[4].mxu1 %v1835_v47  ;;  %v1844_v47 = vld [vmem:[%s2596_s1 + $0xf0] ss:$8 sps:$4 sm:$0xff]   ;;  %v1157_v54 = vpack.c.bf16 %v2286_v45, %v2283_v44 }
  0x43   : > { %677 = vmatpush1.bf16.xpose.msra.mxu1 %v229_v58  ;;  %581 = vmatprep.mubr.bf16.mxu1 %v1839_v49  ;;  %v1848_v49 = vld [vmem:[%s2596_s1 + $0x104] ss:$8 sps:$4 sm:$0xff]  }
  0x44   : > { %678 = vmatprep.subr.bf16.mxu1 %v232_v15  ;;  %990 = vrot.lane.b32.xlu0 %v2057_v6, %s1905_s25  ;;  %v1324_v58 = vld [vmem:[%s2597_s2 + $0x20] sm:$0xff] }
  0x45   : > { %918 = vmatmul.mubr.bf16.gmra.mrb[8].mxu0 %v1838_v48  ;;  %1339 = vperm.xlu1 %1823, %v1321_v30   ;;  %v234_v48 = vpack.c.bf16 %v2082_v23, %v2035_v55  ;;  %v1851_v15 = vld [vmem:[%s2596_s1 + $0xa4] ss:$8 sps:$4 sm:$0xff]   ;;  %v1853_v30 = vld [vmem:[%s2596_s1 + $0xa0] ss:$8 sps:$4 sm:$0xff]  }
  0x46   : > { %925 = vmatprep.mubr.bf16.mxu0 %v1842_v22  ;;  %1224 = vmatpush1.bf16.xpose.msra.mxu0 %v1155_v25  ;;  %v1320_v22 = vld [vmem:[%s2597_s2] sm:$0xff] }
  0x47   : > { %1225 = vmatprep.subr.bf16.mxu0 %v1158_v32  ;;  %v1328_v25 = vld [vmem:[%s2597_s2 + $0x40] sm:$0xff]  ;;  %v1857_v32 = vld [vmem:[%s2596_s1 + $0xb4] ss:$8 sps:$4 sm:$0xff]  }
  0x48   : > { %1334 = vperm.xlu0 %1822, %v1320_v22   ;;  %v1872_v22 = vld [vmem:[%s2596_s1 + $0x144] ss:$8 sps:$4 sm:$0xff]  }
  0x49   : > { %1344 = vperm.xlu1 %1823, %v1322_v43   ;;  %v1859_v43 = vld [vmem:[%s2596_s1 + $0xb0] ss:$8 sps:$4 sm:$0xff]  }
  0x4a   : > { %582 = vmatmul.mubr.bf16.gmra.mrb[8].mxu1 %v1841_v40  ;;  %v1325_v40 = vld [vmem:[%s2597_s2 + $0x28] sm:$0xff] }
  0x4b   : > { %589 = vmatprep.mubr.bf16.mxu1 %v1845_v41  ;;  %679 = vmatpush1.bf16.xpose.msra.mxu1 %v231_v42  ;;  %v1404_v41 = vld [vmem:[%s2598_s3] sm:$0xff]  ;;  %v1327_v42 = vld [vmem:[%s2597_s2 + $0x38] sm:$0xff] }
  0x4c   : > { %680 = vmatprep.subr.bf16.mxu1 %v234_v48  ;;  %1349 = vperm.xlu0 %1822, %v1323_v26   ;;  %v1406_v48 = vld [vmem:[%s2598_s3 + $0x10] sm:$0xff]  ;;  %v1412_v26 = vld [vmem:[%s2598_s3 + $0x40] sm:$0xff] }
  0x4d   : > { %926 = vmatmul.mubr.bf16.gmra.mrb[12].mxu0 %v1844_v47  ;;  %1354 = vperm.xlu1 %1823, %v1324_v58   ;;  %v1865_v47 = vld [vmem:[%s2596_s1 + $0x4] ss:$8 sps:$4 sm:$0xff]  }
  0x4e   : > { %933 = vmatprep.mubr.bf16.mxu0 %v1848_v49  ;;  %1226 = vmatpush1.bf16.xpose.msra.mxu0 %v1157_v54  ;;  %v1860_v49 = vld [vmem:[%s2596_s1 + $0x120] ss:$8 sps:$4 sm:$0xff]   ;;  %v1866_v54 = vld [vmem:[%s2596_s1 + $0x134] ss:$8 sps:$4 sm:$0xff]  }
  0x4f   : > { %v1329_v58 = vld [vmem:[%s2597_s2 + $0x48] sm:$0xff] }
  0x50   : > { %1359 = vperm.xlu0 %1822, %v1325_v40   ;;  %v1878_v40 = vld [vmem:[%s2596_s1 + $0x154] ss:$8 sps:$4 sm:$0xff]  }
  0x51   : > { %1364 = vperm.xlu1 %1823, %v1326_v16   ;;  %v1869_v16 = vld [vmem:[%s2596_s1 + $0x14] ss:$8 sps:$4 sm:$0xff]  }
  0x52   : > { %590 = vmatmul.mubr.bf16.gmra.mrb[12].mxu1 %v1847_v13  ;;  %v1408_v13 = vld [vmem:[%s2598_s3 + $0x20] sm:$0xff] }
  0x53   : > { %597 = vmatprep.mubr.bf16.mxu1 %v1851_v15  ;;  %681 = vmatpush1.bf16.xpose.msra.mxu1 %v233_v14  ;;  %v1331_v14 = vld [vmem:[%s2597_s2 + $0x58] sm:$0xff]  ;;  %v1863_v15 = vld [vmem:[%s2596_s1] ss:$8 sps:$4 sm:$0xff]  }
  0x54   : > { %1369 = vperm.xlu0 %1822, %v1327_v42   ;;  %v1411_v42 = vld [vmem:[%s2598_s3 + $0x38] sm:$0xff] }
  0x55   : > { %934 = vmatmul.mubr.bf16.gmra.mrb[16].mxu0 %v1850_v17  ;;  %1374 = vperm.xlu1 %1823, %v1328_v25   ;;  %v1410_v17 = vld [vmem:[%s2598_s3 + $0x30] sm:$0xff]  ;;  %v1405_v25 = vld [vmem:[%s2598_s3 + $0x8] sm:$0xff] }
  0x56   : > { %941 = vmatprep.mubr.bf16.mxu0 %v1854_v21  ;;  %v1868_v21 = vld [vmem:[%s2596_s1 + $0x130] ss:$8 sps:$4 sm:$0xff]  }
  0x58   : > { %1379 = vperm.xlu0 %1822, %v1329_v58   ;;  %v1415_v58 = vld [vmem:[%s2598_s3 + $0x58] sm:$0xff] }
  0x59   : > { %1384 = vperm.xlu1 %1823, %v1330_v35   ;;  %v1875_v35 = vld [vmem:[%s2596_s1 + $0x24] ss:$8 sps:$4 sm:$0xff]  }
  0x5a   : > { %598 = vmatmul.mubr.bf16.gmra.mrb[16].mxu1 %v1853_v30  ;;  %v1407_v30 = vld [vmem:[%s2598_s3 + $0x18] sm:$0xff] }
  0x5b   : > { %605 = vmatprep.mubr.bf16.mxu1 %v1857_v32  ;;  %v1871_v32 = vld [vmem:[%s2596_s1 + $0x10] ss:$8 sps:$4 sm:$0xff]  }
  0x5c   : > { %1389 = vperm.xlu0 %1822, %v1331_v14   ;;  %v1887_v14 = vld [vmem:[%s2596_s1 + $0x44] ss:$8 sps:$4 sm:$0xff]  }
  0x5d   : > { %942 = vmatmul.mubr.bf16.gmra.mrb[20].mxu0 %v1856_v37  ;;  %1418 = vperm.xlu1 %1823, %v1404_v41   ;;  %v1414_v37 = vld [vmem:[%s2598_s3 + $0x50] sm:$0xff]  ;;  %v1409_v41 = vld [vmem:[%s2598_s3 + $0x28] sm:$0xff] }
  0x5e   : > { %1251 = vmatprep.mubr.bf16.mxu0 %v1862_v38  ;;  %v1874_v38 = vld [vmem:[%s2596_s1 + $0x140] ss:$8 sps:$4 sm:$0xff]  }
  0x60   : > { %1423 = vperm.xlu0 %1822, %v1405_v25   ;;  %v1892_v25 = vld [vmem:[%s2596_s1 + $0x170] ss:$8 sps:$4 sm:$0xff]  }
  0x61   : > { %1428 = vperm.xlu1 %1823, %v1406_v48   ;;  %v1880_v48 = vld [vmem:[%s2596_s1 + $0x150] ss:$8 sps:$4 sm:$0xff]  }
  0x62   : > { %606 = vmatmul.mubr.bf16.gmra.mrb[20].mxu1 %v1859_v43  ;;  %v1877_v43 = vld [vmem:[%s2596_s1 + $0x20] ss:$8 sps:$4 sm:$0xff]  }
  0x63   : > { %706 = vmatprep.mubr.bf16.mxu1 %v1865_v47  ;;  %v1881_v47 = vld [vmem:[%s2596_s1 + $0x34] ss:$8 sps:$4 sm:$0xff]  }
  0x64   : > { %1433 = vperm.xlu0 %1822, %v1407_v30  }
  0x65   : > { %1252 = vmatmul.mubr.bf16.vlgmr.msra.gmra.mrb[0].mxu0 %v1860_v49  ;;  %1438 = vperm.xlu1 %1823, %v1408_v13   ;;  %v1884_v49 = vld [vmem:[%s2596_s1 + $0x164] ss:$8 sps:$4 sm:$0xff]   ;;  %v1883_v13 = vld [vmem:[%s2596_s1 + $0x30] ss:$8 sps:$4 sm:$0xff]  }
  0x66   : > { %1259 = vmatprep.mubr.bf16.mxu0 %v1866_v54  ;;  %v1413_v54 = vld [vmem:[%s2598_s3 + $0x48] sm:$0xff] }
  0x68   : > { %1443 = vperm.xlu0 %1822, %v1409_v41  }
  0x69   : > { %1448 = vperm.xlu1 %1823, %v1410_v17  }
  0x6a   : > { %707 = vmatmul.mubr.bf16.vlgmr.msra.gmra.mrb[0].mxu1 %v1863_v15  ;;  %v1886_v15 = vld [vmem:[%s2596_s1 + $0x160] ss:$8 sps:$4 sm:$0xff]  }
  0x6b   : > { %714 = vmatprep.mubr.bf16.mxu1 %v1869_v16  ;;  %v1890_v16 = vld [vmem:[%s2596_s1 + $0x174] ss:$8 sps:$4 sm:$0xff]  }
  0x6c   : > { %1453 = vperm.xlu0 %1822, %v1411_v42  }
  0x6d   : > { %1260 = vmatmul.mubr.bf16.gmra.mrb[4].mxu0 %v1868_v21  ;;  %1458 = vperm.xlu1 %1823, %v1412_v26   ;;  %v1889_v21 = vld [vmem:[%s2596_s1 + $0x40] ss:$8 sps:$4 sm:$0xff]  }
  0x6e   : > { %1267 = vmatprep.mubr.bf16.mxu0 %v1872_v22  ;;  %v1893_v22 = vld [vmem:[%s2596_s1 + $0x54] ss:$8 sps:$4 sm:$0xff]  }
  0x70   : > { %1463 = vperm.xlu0 %1822, %v1413_v54  }
  0x71   : > { %1468 = vperm.xlu1 %1823, %v1414_v37  }
  0x72   : > { %715 = vmatmul.mubr.bf16.gmra.mrb[4].mxu1 %v1871_v32 }
  0x73   : > { %722 = vmatprep.mubr.bf16.mxu1 %v1875_v35  ;;  %v1895_v35 = vld [vmem:[%s2596_s1 + $0x50] ss:$8 sps:$4 sm:$0xff]  }
  0x74   : > { %1473 = vperm.xlu0 %1822, %v1415_v58  }
  0x75   : > { %1268 = vmatmul.mubr.bf16.gmra.mrb[8].mxu0 %v1874_v38 }
  0x76   : > { %1275 = vmatprep.mubr.bf16.mxu0 %v1878_v40 }
  0x7a   : > { %723 = vmatmul.mubr.bf16.gmra.mrb[8].mxu1 %v1877_v43 }
  0x7b   : > { %730 = vmatprep.mubr.bf16.mxu1 %v1881_v47 }
  0x7d   : > { %1276 = vmatmul.mubr.bf16.gmra.mrb[12].mxu0 %v1880_v48 }
  0x7e   : > { %1283 = vmatprep.mubr.bf16.mxu0 %v1884_v49 }
  0x82   : > { %731 = vmatmul.mubr.bf16.gmra.mrb[12].mxu1 %v1883_v13 }
  0x83   : > { %738 = vmatprep.mubr.bf16.mxu1 %v1887_v14 }
  0x85   : > { %1284 = vmatmul.mubr.bf16.gmra.mrb[16].mxu0 %v1886_v15  ;;  %v248_v17 = vpop.permute.xlu1 %247 }
  0x86   : > { %1291 = vmatprep.mubr.bf16.mxu0 %v1890_v16  ;;  %v269_v54 = vmax.f32 %v1965_v7, %v248_v17 }
  0x89   : > { %v244_v26 = vpop.permute.xlu0 %243 }
  0x8a   : > { %739 = vmatmul.mubr.bf16.gmra.mrb[16].mxu1 %v1889_v21  ;;  %v250_v30 = vpop.permute.xlu1 %249  ;;  %v267_v40 = vmax.f32 %v1986_v27, %v244_v26  ;;  %v277_v27 = vmax.f32 %v269_v54, %v1957_v4 }
  0x8b   : > { %746 = vmatprep.mubr.bf16.mxu1 %v1893_v22  ;;  %v270_v13 = vmax.f32 %v2004_v33, %v250_v30 }
  0x8c   : > { %v275_v47 = vmax.f32 %v267_v40, %v2092_v39 }
  0x8d   : > { %1292 = vmatmul.mubr.bf16.gmra.mrb[20].mxu0 %v1892_v25  ;;  %v246_v32 = vpop.permute.xlu0 %245  ;;  %v278_v26 = vmax.f32 %v270_v13, %v1989_v28 }
  0x8e   : > { %v254_v37 = vpop.permute.xlu1 %253  ;;  %v268_v41 = vmax.f32 %v1960_v5, %v246_v32 }
  0x8f   : > { %v272_v17 = vmax.f32 %v2038_v56, %v254_v37 }
  0x90   : > { %v276_v49 = vmax.f32 %v268_v41, %v1954_v3 }
  0x92   : > { %v252_v38 = vpop.permute.xlu0 %251  ;;  %747 = vmatmul.mubr.bf16.gmra.mrb[20].mxu1 %v1895_v35  ;;  %v258_v42 = vpop.permute.xlu1 %257 }
  0x93   : > { %v271_v22 = vmax.f32 %v2007_v34, %v252_v38 }
  0x95   : > { %v279_v40 = vmax.f32 %v271_v22, %v1992_v29 }
  0x96   : > { %v256_v43 = vpop.permute.xlu0 %255 }
  0x97   : > { %v294_v48 = vpop.permute.xlu1 %293 }
  0x98   : > { %v316_v15 = vmax.f32 %v276_v49, %v294_v48 }
  0x9a   : > { %v292_v58 = vpop.permute.xlu0 %291  ;;  %v756_v39 = vmax.f32 %v316_v15, %v2011_v36  ;;  %v280_v36 = vmax.f32 %v272_v17, %v2024_v46 }
  0x9b   : > { %v315_v14 = vmax.f32 %v275_v47, %v292_v58  ;;  %v298_v16 = vpop.permute.xlu1 %297 }
  0x9c   : > { %v318_v30 = vmax.f32 %v278_v26, %v298_v16  ;;  %v764_v47 = vmax.f32 %v756_v39, %v1983_v24 }
  0x9d   : > { %v755_v25 = vmax.f32 %v315_v14, %v1997_v31  ;;  %v273_v31 = vmax.f32 %v2063_v9, %v256_v43 }
  0x9e   : > { %v296_v21 = vpop.permute.xlu0 %295  ;;  %v758_v48 = vmax.f32 %v318_v30, %v2060_v8  ;;  %v963_v54 = vmax.f32 %v764_v47, %v1965_v7 }
  0x9f   : > { %v302_v3 = vpop.permute.xlu1 %301  ;;  %v317_v32 = vmax.f32 %v277_v27, %v296_v21  ;;  %v763_v4 = vmax.f32 %v755_v25, %v1978_v19  ;;  %v274_v19 = vmax.f32 %v2057_v6, %v258_v42 }
  0xa0   : > { %v320_v24 = vmax.f32 %v280_v36, %v302_v3  ;;  %v766_v8 = vmax.f32 %v758_v48, %v2041_v57 }
  0xa1   : > { %v757_v38 = vmax.f32 %v317_v32, %v2052_v63  ;;  %v962_v37 = vmax.f32 %v763_v4, %v1960_v5  ;;  %v281_v63 = vmax.f32 %v273_v31, %v2035_v55 }
  0xa2   : > { %v300_v35 = vpop.permute.xlu0 %299  ;;  %v760_v7 = vmax.f32 %v320_v24, %v2105_v52  ;;  %v965_v27 = vmax.f32 %v766_v8, %v2007_v34 }
  0xa3   : > { %v306_v41 = vpop.permute.xlu1 %305  ;;  %v319_v49 = vmax.f32 %v279_v40, %v300_v35  ;;  %v765_v29 = vmax.f32 %v757_v38, %v2031_v51  ;;  %v282_v51 = vmax.f32 %v274_v19, %v2082_v23 }
  0xa5   : > { %v759_v43 = vmax.f32 %v319_v49, %v2102_v50  ;;  %v964_v15 = vmax.f32 %v765_v29, %v2004_v33  ;;  %v322_v57 = vmax.f32 %v282_v51, %v306_v41  ;;  %v768_v33 = vmax.f32 %v760_v7, %v2077_v20 }
  0xa6   : > { %v304_v28 = vpop.permute.xlu0 %303 }
  0xa7   : > { %v981_v58 = vpop.permute.xlu1 %980  ;;  %v321_v16 = vmax.f32 %v281_v63, %v304_v28  ;;  %v767_v50 = vmax.f32 %v759_v43, %v2074_v18  ;;  %v762_v39 = vmax.f32 %v322_v57, %v2150_v2  ;;  %v967_v26 = vmax.f32 %v768_v33, %v2063_v9 }
  0xa8   : > { %v1003_v14 = vmax.f32 %v963_v54, %v981_v58 }
  0xa9   : > { %v966_v25 = vmax.f32 %v767_v50, %v2038_v56  ;;  %v770_v56 = vmax.f32 %v762_v39, %v2118_v60 }
  0xaa   : > { %v979_v13 = vpop.permute.xlu0 %978  ;;  %v1313_v42 = vmax.f32 %v1003_v14, %v2161_v61 }
  0xab   : > { %v1002_v46 = vmax.f32 %v962_v37, %v979_v13  ;;  %v985_v22 = vpop.permute.xlu1 %984  ;;  %v969_v35 = vmax.f32 %v770_v56, %v2108_v53 }
  0xac   : > { %v1005_v23 = vmax.f32 %v965_v27, %v985_v22 }
  0xad   : > { %v1312_v5 = vmax.f32 %v1002_v46, %v2158_v11  ;;  %v761_v11 = vmax.f32 %v321_v16, %v2147_v1 }
  0xae   : > { %v983_v55 = vpop.permute.xlu0 %982  ;;  %v1315_v34 = vmax.f32 %v1005_v23, %v2210_v62 }
  0xaf   : > { %1500 = vxpose.xlu1.b32.start [1/8] (short) (narrow) %v1312_v5, 64  ;;  %v1004_v21 = vmax.f32 %v964_v15, %v983_v55  ;;  %v769_v3 = vmax.f32 %v761_v11, %v2115_v59  ;;  %v989_v20 = vpop.permute.xlu1 %988 }
  0xb1   : > { %v1314_v52 = vmax.f32 %v1004_v21, %v2207_v10  ;;  %v1007_v10 = vmax.f32 %v967_v26, %v989_v20  ;;  %v968_v32 = vmax.f32 %v769_v3, %v2057_v6 }
  0xb2   : > { %v987_v61 = vpop.permute.xlu0 %986 }
  0xb3   : > { %1501 = vxpose.xlu1.b32.cont [2/8] (short) (narrow) %v1313_v42, 64  ;;  %v1006_v18 = vmax.f32 %v966_v25, %v987_v61  ;;  %v1317_v2 = vmax.f32 %v1007_v10, %v2248_v12  ;;  %v993_v30 = vpop.permute.xlu1 %992 }
  0xb4   : > { %v1009_v59 = vmax.f32 %v969_v35, %v993_v30 }
  0xb5   : > { %v1316_v1 = vmax.f32 %v1006_v18, %v2245_v0 }
  0xb6   : > { %v991_v17 = vpop.permute.xlu0 %990  ;;  %v1319_v0 = vmax.f32 %v1009_v59, %v2286_v45 }
  0xb7   : > { %1502 = vxpose.xlu1.b32.cont [3/8] (short) (narrow) %v1314_v52, 64  ;;  %v1008_v62 = vmax.f32 %v968_v32, %v991_v17 }
  0xb9   : > { %v1318_v9 = vmax.f32 %v1008_v62, %v2283_v44 }
  0xbb   : > { %1503 = vxpose.xlu1.b32.cont [4/8] (short) (narrow) %v1315_v34, 64 }
  0xbf   : > { %1504 = vxpose.xlu1.b32.cont [5/8] (short) (narrow) %v1316_v1, 64 }
  0xc3   : > { %1505 = vxpose.xlu1.b32.cont [6/8] (short) (narrow) %v1317_v2, 64 }
  0xc4   : > { %v1340_v6 = vpop.permute.xlu1 %1339 }
  0xc7   : > { %1506 = vxpose.xlu1.b32.cont [7/8] (short) (narrow) %v1318_v9, 64  ;;  %v1335_v45 = vpop.permute.xlu0 %1334 }
  0xc8   : > { %v1345_v40 = vpop.permute.xlu1 %1344 }
  0xcb   : > { %1507 = vxpose.xlu1.b32.end [8/8] (short) (narrow) %v1319_v0, 64  ;;  %v1350_v36 = vpop.permute.xlu0 %1349 }
  0xcc   : > { %v2510_v60 = vpop.permute.xlu1 %1354 }
  0xcf   : > { %v2527_v48 = vpop.permute.xlu0 %1359 }
  0xd0   : > { %v2512_v41 = vpop.permute.xlu1 %1364 }
  0xd3   : > { %v2536_v37 = vpop.permute.xlu0 %1369 }
  0xd4   : > { %v2514_v12 = vpop.permute.xlu1 %1374 }
  0xd7   : > { %v2540_v58 = vpop.permute.xlu0 %1379 }
  0xd8   : > { %v2516_v4 = vpop.permute.xlu1 %1384 }
  0xdb   : > { %v2546_v46 = vpop.permute.xlu0 %1389 }
  0xdc   : > { %v1419_v53 = vpop.permute.xlu1 %1418 }
  0xdf   : > { %v1424_v11 = vpop.permute.xlu0 %1423 }
  0xe0   : > { %v1429_v47 = vpop.permute.xlu1 %1428 }
  0xe3   : > { %v1434_v30 = vpop.permute.xlu0 %1433 }
  0xe4   : > { %v2518_v44 = vpop.permute.xlu1 %1438 }
  0xe8   : > { %v2520_v38 = vpop.permute.xlu1 %1448 }
  0xec   : > { %v2522_v31 = vpop.permute.xlu1 %1458 }
  0xf0   : > { %v2524_v28 = vpop.permute.xlu1 %1468 }
 0x12f   : > { %v1516_v49 = vpop.trf.xlu1 }
 0x130   : > { %1533 = vst.msk [vmem:[%s2532_s26] sm:$0xff] %vm1532_vm1, %v1516_v49 }
 0x133   : > { %v1517_v54 = vpop.trf.xlu1 }
 0x134   : > { %1534 = vst.msk [vmem:[%s2532_s26 + $0x8] sm:$0xff] %vm1532_vm1, %v1517_v54 }
 0x137   : > { %v1518_v29 = vpop.trf.xlu1 }
 0x138   : > { %v1253_v19 = vpop.f32.mrb[0].mxu0  ;;  %1535 = vst.msk [vmem:[%s2532_s26 + $0x10] sm:$0xff] %vm1532_vm1, %v1518_v29 }
 0x139   : > { %v1255_v24 = vpop.f32.mrb[1].mxu0 }
 0x13a   : > { %v1256_v63 = vpop.f32.mrb[2].mxu0 }
 0x13b   : > { %v1258_v13 = vpop.f32.mrb[3].mxu0  ;;  %v1519_v43 = vpop.trf.xlu1 }
 0x13c   : > { %1536 = vst.msk [vmem:[%s2532_s26 + $0x18] sm:$0xff] %vm1532_vm1, %v1519_v43  ;;  %v1444_v43 = vpop.permute.xlu0 %1443 }
 0x13d   : > { %v708_v14 = vpop.f32.mrb[0].mxu1 }
 0x13e   : > { %v1749_v8 = vadd.f32 %v1253_v19, %v708_v14  ;;  %v710_v15 = vpop.f32.mrb[1].mxu1 }
 0x13f   : > { %v1520_v5 = vpop.trf.xlu1  ;;  %v711_v7 = vpop.f32.mrb[2].mxu1 }
 0x140   : > { %v1261_v51 = vpop.f32.mrb[4].mxu0  ;;  %1537 = vst.msk [vmem:[%s2532_s26 + $0x20] sm:$0xff] %vm1532_vm1, %v1520_v5  ;;  %v1392_v16 = vmul.f32 %v1749_v8, %v1335_v45  ;;  %v1750_v42 = vadd.f32 %v1256_v63, %v711_v7  ;;  %v713_v55 = vpop.f32.mrb[3].mxu1 }
 0x141   : > { %v1263_v27 = vpop.f32.mrb[5].mxu0 }
 0x142   : > { %v1264_v50 = vpop.f32.mrb[6].mxu0  ;;  %v1476_v21 = vadd.f32 %v1419_v53, %v1392_v16  ;;  %v1393_v22 = vmul.f32 %v1750_v42, %v1340_v6 }
 0x143   : > { %v1266_v57 = vpop.f32.mrb[7].mxu0  ;;  %v1521_v33 = vpop.trf.xlu1 }
 0x144   : > { %1538 = vst.msk [vmem:[%s2532_s26 + $0x28] sm:$0xff] %vm1532_vm1, %v1521_v33  ;;  %v1488_v52 = vmax.f32 %v1476_v21, 0.0  ;;  %v1477_v23 = vadd.f32 %v1424_v11, %v1393_v22  ;;  %v1454_v57 = vpop.permute.xlu0 %1453 }
 0x145   : > { %v716_v25 = vpop.f32.mrb[4].mxu1 }
 0x146   : > { %1541 = vst.msk [vmem:[%s2532_s26 + $0x40] sm:$0xff] %vm1532_vm1, %v1488_v52  ;;  %v1489_v61 = vmax.f32 %v1477_v23, 0.0  ;;  %v1751_v39 = vadd.f32 %v1261_v51, %v716_v25  ;;  %v718_v34 = vpop.f32.mrb[5].mxu1 }
 0x147   : > { %v1522_v18 = vpop.trf.xlu1  ;;  %v719_v26 = vpop.f32.mrb[6].mxu1 }
 0x148   : > { %v1269_v3 = vpop.f32.mrb[8].mxu0  ;;  %1539 = vst.msk [vmem:[%s2532_s26 + $0x30] sm:$0xff] %vm1532_vm1, %v1522_v18  ;;  %1542 = vst.msk [vmem:[%s2532_s26 + $0x48] sm:$0xff] %vm1532_vm1, %v1489_v61  ;;  %v1394_v20 = vmul.f32 %v1751_v39, %v1345_v40  ;;  %v1752_v1 = vadd.f32 %v1264_v50, %v719_v26  ;;  %v721_v10 = vpop.f32.mrb[7].mxu1 }
 0x149   : > { %v1271_v32 = vpop.f32.mrb[9].mxu0  ;;  %v1464_v10 = vpop.permute.xlu0 %1463 }
 0x14a   : > { %v1272_v56 = vpop.f32.mrb[10].mxu0  ;;  %v1478_v17 = vadd.f32 %v1429_v47, %v1394_v20  ;;  %v1395_v2 = vmul.f32 %v1752_v1, %v1350_v36 }
 0x14b   : > { %v1274_v62 = vpop.f32.mrb[11].mxu0  ;;  %v1523_v35 = vpop.trf.xlu1 }
 0x14c   : > { %1540 = vst.msk [vmem:[%s2532_s26 + $0x38] sm:$0xff] %vm1532_vm1, %v1523_v35  ;;  %v1490_v9 = vmax.f32 %v1478_v17, 0.0  ;;  %v1479_v59 = vadd.f32 %v1434_v30, %v1395_v2 }
 0x14d   : > { %v724_v0 = vpop.f32.mrb[8].mxu1 }
 0x14e   : > { %1543 = vst.msk [vmem:[%s2532_s26 + $0x50] sm:$0xff] %vm1532_vm1, %v1490_v9  ;;  %v1491_v6 = vmax.f32 %v1479_v59, 0.0  ;;  %v1753_v53 = vadd.f32 %v1269_v3, %v724_v0  ;;  %v726_v40 = vpop.f32.mrb[9].mxu1  ;;  %v1474_v0 = vpop.permute.xlu0 %1473 }
 0x14f   : > { %v727_v45 = vpop.f32.mrb[10].mxu1 }
 0x150   : > { %v1277_v49 = vpop.f32.mrb[12].mxu0  ;;  %1544 = vst.msk [vmem:[%s2532_s26 + $0x58] sm:$0xff] %vm1532_vm1, %v1491_v6  ;;  %v1396_v47 = vmul.f32 %v1753_v53, %v2510_v60  ;;  %v1754_v36 = vadd.f32 %v1272_v56, %v727_v45  ;;  %v729_v54 = vpop.f32.mrb[11].mxu1 }
 0x151   : > { %v1279_v29 = vpop.f32.mrb[13].mxu0 }
 0x152   : > { %v1280_v19 = vpop.f32.mrb[14].mxu0  ;;  %v1480_v24 = vadd.f32 %v2518_v44, %v1396_v47  ;;  %v1397_v63 = vmul.f32 %v1754_v36, %v2527_v48 }
 0x153   : > { %v1282_v13 = vpop.f32.mrb[15].mxu0 }
 0x154   : > { %v1492_v14 = vmax.f32 %v1480_v24, 0.0  ;;  %v1481_v8 = vadd.f32 %v1444_v43, %v1397_v63 }
 0x155   : > { %v732_v15 = vpop.f32.mrb[12].mxu1 }
 0x156   : > { %1545 = vst.msk [vmem:[%s2532_s26 + $0x60] sm:$0xff] %vm1532_vm1, %v1492_v14  ;;  %v1493_v5 = vmax.f32 %v1481_v8, 0.0  ;;  %v1755_v7 = vadd.f32 %v1277_v49, %v732_v15  ;;  %v734_v51 = vpop.f32.mrb[13].mxu1 }
 0x157   : > { %v735_v60 = vpop.f32.mrb[14].mxu1 }
 0x158   : > { %v1285_v16 = vpop.f32.mrb[16].mxu0  ;;  %1546 = vst.msk [vmem:[%s2532_s26 + $0x68] sm:$0xff] %vm1532_vm1, %v1493_v5  ;;  %v1398_v42 = vmul.f32 %v1755_v7, %v2512_v41  ;;  %v1756_v44 = vadd.f32 %v1280_v19, %v735_v60  ;;  %v737_v55 = vpop.f32.mrb[15].mxu1 }
 0x159   : > { %v1287_v48 = vpop.f32.mrb[17].mxu0 }
 0x15a   : > { %v1288_v27 = vpop.f32.mrb[18].mxu0  ;;  %v1482_v50 = vadd.f32 %v2520_v38, %v1398_v42  ;;  %v1399_v21 = vmul.f32 %v1756_v44, %v2536_v37 }
 0x15b   : > { %v1290_v22 = vpop.f32.mrb[19].mxu0 }
 0x15c   : > { %v1494_v33 = vmax.f32 %v1482_v50, 0.0  ;;  %v1483_v11 = vadd.f32 %v1454_v57, %v1399_v21 }
 0x15d   : > { %v740_v52 = vpop.f32.mrb[16].mxu1 }
 0x15e   : > { %1547 = vst.msk [vmem:[%s2532_s26 + $0x70] sm:$0xff] %vm1532_vm1, %v1494_v33  ;;  %v1495_v23 = vmax.f32 %v1483_v11, 0.0  ;;  %v1757_v25 = vadd.f32 %v1285_v16, %v740_v52  ;;  %v742_v61 = vpop.f32.mrb[17].mxu1 }
 0x15f   : > { %v743_v41 = vpop.f32.mrb[18].mxu1 }
 0x160   : > { %v1293_v39 = vpop.f32.mrb[20].mxu0  ;;  %1548 = vst.msk [vmem:[%s2532_s26 + $0x78] sm:$0xff] %vm1532_vm1, %v1495_v23  ;;  %v1400_v34 = vmul.f32 %v1757_v25, %v2514_v12  ;;  %v1758_v38 = vadd.f32 %v1288_v27, %v743_v41  ;;  %v745_v37 = vpop.f32.mrb[19].mxu1 }
 0x161   : > { %v1295_v18 = vpop.f32.mrb[21].mxu0 }
 0x162   : > { %v1296_v26 = vpop.f32.mrb[22].mxu0  ;;  %v1484_v3 = vadd.f32 %v2522_v31, %v1400_v34  ;;  %v1401_v20 = vmul.f32 %v1758_v38, %v2540_v58 }
 0x163   : > { %v1298_v1 = vpop.f32.mrb[23].mxu0 }
 0x164   : > { %v1496_v32 = vmax.f32 %v1484_v3, 0.0  ;;  %v1485_v56 = vadd.f32 %v1464_v10, %v1401_v20 }
 0x165   : > { %v748_v17 = vpop.f32.mrb[20].mxu1 }
 0x166   : > { %1549 = vst.msk [vmem:[%s2532_s26 + $0x80] sm:$0xff] %vm1532_vm1, %v1496_v32  ;;  %v1497_v2 = vmax.f32 %v1485_v56, 0.0  ;;  %v1759_v12 = vadd.f32 %v1293_v39, %v748_v17  ;;  %v750_v62 = vpop.f32.mrb[21].mxu1 }
 0x167   : > { %v751_v35 = vpop.f32.mrb[22].mxu1 }
 0x168   : > { %1550 = vst.msk [vmem:[%s2532_s26 + $0x88] sm:$0xff] %vm1532_vm1, %v1497_v2  ;;  %v1402_v30 = vmul.f32 %v1759_v12, %v2516_v4  ;;  %v1760_v31 = vadd.f32 %v1296_v26, %v751_v35  ;;  %v753_v9 = vpop.f32.mrb[23].mxu1 }
 0x16a   : > { %v1486_v58 = vadd.f32 %v2524_v28, %v1402_v30  ;;  %v1403_v59 = vmul.f32 %v1760_v31, %v2546_v46 }
 0x16c   : > { %v1498_v6 = vmax.f32 %v1486_v58, 0.0  ;;  %v1487_v53 = vadd.f32 %v1474_v0, %v1403_v59 }
 0x16e   : > { %1551 = vst.msk [vmem:[%s2532_s26 + $0x90] sm:$0xff] %vm1532_vm1, %v1498_v6  ;;  %v1499_v40 = vmax.f32 %v1487_v53, 0.0 }
 0x170   : > { %1552 = vst.msk [vmem:[%s2532_s26 + $0x98] sm:$0xff] %vm1532_vm1, %v1499_v40 }
 0x171 PF: > { %s14_s15 = sadd.s32 1, %s1902_s15  }
 0x172   : > { %p11_p4 = scmp.ge.s32.totalorder %s14_s15, 4  }
 0x174   :  { %13 = sbr.rel (!%p11_p4) target bundleno = 1 (0x1), region = 70 }

</bundles_post_ra>
